<compile_context>
chip_gen: v5e
topology: v5e:2x2
jax: 0.10.0
libtpu: 0.0.40
codegen_flags: <defaults>
</compile_context>

<pallas_src>
import functools

import jax
import jax.numpy as jnp
from jax import lax
from jax.experimental import pallas as pl
from jax.experimental.pallas import tpu as pltpu


# --------------------------------------------------------------------------- helpers
def _round_up(x, m):
    return (x + m - 1) // m * m


def _pick_row_tile(m, tm):
    # Biggest row tile <= tm, sublane(8)-aligned, but keep >= 2 grid steps when the row
    # count allows it so a "parallel" axis can shard across v7x's two TensorCores.
    half = _round_up(max((m + 1) // 2, 1), 8)
    return max(8, min(tm, half))


def _pad_rows(x2, mp):
    m = x2.shape[0]
    if m == mp:
        return x2
    return jnp.pad(x2, ((0, mp - m), (0, 0)))


def _nbytes(shape, dtype):
    n = 1
    for s in shape:
        n *= int(s)
    return n * jnp.dtype(dtype).itemsize


def _vmem_limit(*operand_bytes):
    # Conservative: assume every operand is double-buffered, add headroom, clamp to
    # v7x's 64 MiB physical VMEM.
    total = 2 * sum(operand_bytes) + (2 << 20)
    return int(min(max(total, 16 << 20), 64 << 20))


def _weight_spec(shape, single_buffer):
    index_map = lambda i: (0,) * len(shape)
    if single_buffer:
        # Grid-invariant block: a second pipeline buffer is pure VMEM waste.
        return pl.BlockSpec(shape, index_map, pipeline_mode=pl.Buffered(1))
    return pl.BlockSpec(shape, index_map)


# --------------------------------------------------------------------------- kernels
def _qkv_proj_kernel(x_ref, w_ref, b_ref, o_ref, *, mxu_dtype):
    x = x_ref[...].astype(mxu_dtype)
    y = jnp.dot(x, w_ref[...], preferred_element_type=jnp.float32)
    y = y + b_ref[...].astype(jnp.float32)
    o_ref[...] = y.astype(o_ref.dtype)


def _attn_core_kernel(q_ref, kt_ref, v_ref, o_ref, *, scale, mxu_dtype):
    q = q_ref[0].astype(mxu_dtype)          # (S, dk)
    kt = kt_ref[0].astype(mxu_dtype)        # (dk, S)  (transposed in the wrapper)
    v = v_ref[0].astype(mxu_dtype)          # (S, dk)
    s = jnp.dot(q, kt, preferred_element_type=jnp.float32) * scale   # (S, S) f32
    s = s - jnp.max(s, axis=-1, keepdims=True)
    p = jnp.exp(s)
    p = p / jnp.sum(p, axis=-1, keepdims=True)
    # attention-weight dropout is identity at eval time
    o = jnp.dot(p.astype(mxu_dtype), v, preferred_element_type=jnp.float32)
    o_ref[0] = o.astype(o_ref.dtype)


def _outproj_res_ln_kernel(a_ref, x_ref, wo_ref, bo_ref, g_ref, bln_ref, o_ref, *,
                           eps, mxu_dtype):
    a = a_ref[...].astype(mxu_dtype)
    y = jnp.dot(a, wo_ref[...], preferred_element_type=jnp.float32)
    y = y + bo_ref[...].astype(jnp.float32) + x_ref[...].astype(jnp.float32)  # residual
    mean = jnp.mean(y, axis=-1, keepdims=True)
    c = y - mean
    var = jnp.mean(c * c, axis=-1, keepdims=True)
    out = c * lax.rsqrt(var + eps) * g_ref[...].astype(jnp.float32)
    out = out + bln_ref[...].astype(jnp.float32)
    # dropout after the LayerNorm is identity at eval time
    o_ref[...] = out.astype(o_ref.dtype)


def _ffn_ln_kernel(x_ref, w1_ref, b1_ref, w2_ref, b2_ref, g_ref, bln_ref, o_ref, *,
                   eps, mxu_dtype):
    x = x_ref[...].astype(mxu_dtype)
    h = jnp.dot(x, w1_ref[...], preferred_element_type=jnp.float32)
    h = h + b1_ref[...].astype(jnp.float32)
    h = jnp.maximum(h, 0.0)                                   # ReLU (f32 on the VPU)
    # dropout after ReLU is identity at eval time
    y = jnp.dot(h.astype(mxu_dtype), w2_ref[...], preferred_element_type=jnp.float32)
    y = y + b2_ref[...].astype(jnp.float32)
    mean = jnp.mean(y, axis=-1, keepdims=True)
    c = y - mean
    var = jnp.mean(c * c, axis=-1, keepdims=True)
    out = c * lax.rsqrt(var + eps) * g_ref[...].astype(jnp.float32)
    out = out + bln_ref[...].astype(jnp.float32)
    # final dropout is identity at eval time
    o_ref[...] = out.astype(o_ref.dtype)


# --------------------------------------------------------------------------- wrappers
def _linear(x2, w, b, out_dtype, *, mxu_dtype, tm, single_buffer):
    m, d_in = x2.shape
    d_out = w.shape[1]
    tm_eff = _pick_row_tile(m, tm)
    mp = _round_up(m, tm_eff)
    xp = _pad_rows(x2, mp)
    b2 = b.reshape(1, d_out).astype(jnp.float32)
    kernel = functools.partial(_qkv_proj_kernel, mxu_dtype=mxu_dtype)
    row_in = pl.BlockSpec((tm_eff, d_in), lambda i: (i, 0))
    row_out = pl.BlockSpec((tm_eff, d_out), lambda i: (i, 0))
    out = pl.pallas_call(
        kernel,
        out_shape=jax.ShapeDtypeStruct((mp, d_out), out_dtype),
        grid_spec=pltpu.PrefetchScalarGridSpec(
            num_scalar_prefetch=0,
            grid=(mp // tm_eff,),
            in_specs=[
                row_in,
                _weight_spec((d_in, d_out), single_buffer),
                _weight_spec((1, d_out), single_buffer),
            ],
            out_specs=row_out,
        ),
        compiler_params=pltpu.CompilerParams(
            dimension_semantics=("parallel",),
            vmem_limit_bytes=_vmem_limit(
                _nbytes((tm_eff, d_in), xp.dtype),
                _nbytes((d_in, d_out), w.dtype),
                _nbytes((1, d_out), jnp.float32),
                _nbytes((tm_eff, d_out), out_dtype),
            ),
        ),
    )(xp, w, b2)
    return out[:m]


def _attention_core(q, kt, v, *, scale, mxu_dtype):
    bh, s, dk = q.shape
    kernel = functools.partial(_attn_core_kernel, scale=scale, mxu_dtype=mxu_dtype)
    qv_spec = pl.BlockSpec((1, s, dk), lambda i: (i, 0, 0))
    kt_spec = pl.BlockSpec((1, dk, s), lambda i: (i, 0, 0))
    return pl.pallas_call(
        kernel,
        out_shape=jax.ShapeDtypeStruct((bh, s, dk), q.dtype),
        grid_spec=pltpu.PrefetchScalarGridSpec(
            num_scalar_prefetch=0,
            grid=(bh,),
            in_specs=[qv_spec, kt_spec, qv_spec],
            out_specs=qv_spec,
        ),
        compiler_params=pltpu.CompilerParams(
            dimension_semantics=("parallel",),
            vmem_limit_bytes=_vmem_limit(
                3 * _nbytes((1, s, dk), q.dtype),
                _nbytes((1, dk, s), kt.dtype),
                _nbytes((1, s, s), jnp.float32),
            ),
        ),
    )(q, kt, v)


def _outproj_residual_layernorm(attn2, x2, wo, bo, gamma, beta, out_dtype, *,
                                eps, mxu_dtype, tm, single_buffer):
    m, d = x2.shape
    tm_eff = _pick_row_tile(m, tm)
    mp = _round_up(m, tm_eff)
    attn_p = _pad_rows(attn2, mp)
    x_p = _pad_rows(x2, mp)
    bo2 = bo.reshape(1, d).astype(jnp.float32)
    g2 = gamma.reshape(1, d).astype(jnp.float32)
    bl2 = beta.reshape(1, d).astype(jnp.float32)
    kernel = functools.partial(_outproj_res_ln_kernel, eps=eps, mxu_dtype=mxu_dtype)
    row_spec = pl.BlockSpec((tm_eff, d), lambda i: (i, 0))
    out = pl.pallas_call(
        kernel,
        out_shape=jax.ShapeDtypeStruct((mp, d), out_dtype),
        grid_spec=pltpu.PrefetchScalarGridSpec(
            num_scalar_prefetch=0,
            grid=(mp // tm_eff,),
            in_specs=[
                row_spec,                               # attention output tile
                row_spec,                               # residual x tile
                _weight_spec((d, d), single_buffer),    # out_proj weight
                _weight_spec((1, d), single_buffer),    # out_proj bias
                _weight_spec((1, d), single_buffer),    # LayerNorm gamma
                _weight_spec((1, d), single_buffer),    # LayerNorm beta
            ],
            out_specs=row_spec,
        ),
        compiler_params=pltpu.CompilerParams(
            dimension_semantics=("parallel",),
            vmem_limit_bytes=_vmem_limit(
                2 * _nbytes((tm_eff, d), attn_p.dtype),
                _nbytes((d, d), wo.dtype),
                3 * _nbytes((1, d), jnp.float32),
                _nbytes((tm_eff, d), out_dtype),
            ),
        ),
    )(attn_p, x_p, wo, bo2, g2, bl2)
    return out[:m]


def _ffn_layernorm(x2, w1, b1, w2, b2, gamma, beta, out_dtype, *,
                   eps, mxu_dtype, tm, single_buffer):
    m, d = x2.shape
    dff = w1.shape[1]
    tm_eff = _pick_row_tile(m, tm)
    mp = _round_up(m, tm_eff)
    xp = _pad_rows(x2, mp)
    b1_2 = b1.reshape(1, dff).astype(jnp.float32)
    b2_2 = b2.reshape(1, d).astype(jnp.float32)
    g2 = gamma.reshape(1, d).astype(jnp.float32)
    bl2 = beta.reshape(1, d).astype(jnp.float32)
    kernel = functools.partial(_ffn_ln_kernel, eps=eps, mxu_dtype=mxu_dtype)
    row_spec = pl.BlockSpec((tm_eff, d), lambda i: (i, 0))
    out = pl.pallas_call(
        kernel,
        out_shape=jax.ShapeDtypeStruct((mp, d), out_dtype),
        grid_spec=pltpu.PrefetchScalarGridSpec(
            num_scalar_prefetch=0,
            grid=(mp // tm_eff,),
            in_specs=[
                row_spec,
                _weight_spec((d, dff), single_buffer),
                _weight_spec((1, dff), single_buffer),
                _weight_spec((dff, d), single_buffer),
                _weight_spec((1, d), single_buffer),
                _weight_spec((1, d), single_buffer),
                _weight_spec((1, d), single_buffer),
            ],
            out_specs=row_spec,
        ),
        compiler_params=pltpu.CompilerParams(
            dimension_semantics=("parallel",),
            vmem_limit_bytes=_vmem_limit(
                _nbytes((tm_eff, d), xp.dtype),
                _nbytes((d, dff), w1.dtype),
                _nbytes((dff, d), w2.dtype),
                _nbytes((1, dff), jnp.float32),
                3 * _nbytes((1, d), jnp.float32),
                _nbytes((tm_eff, dff), jnp.float32),     # live h intermediate
                _nbytes((tm_eff, d), out_dtype),
            ),
        ),
    )(xp, w1, b1_2, w2, b2_2, g2, bl2)
    return out[:m]


# --------------------------------------------------------------------------- forward
def attention_block_forward(x, params, *, n_heads, tm=256, eps=1e-5,
                            compute_dtype=None, single_buffer_weights=True):
    """x: (seq, batch, d_model), like the PyTorch module. Returns the same shape."""
    seq, batch, d = x.shape
    assert d % n_heads == 0, "n_features must be divisible by n_heads"
    dk = d // n_heads
    mxu_dtype = jnp.dtype(compute_dtype) if compute_dtype is not None else x.dtype
    act_dtype = x.dtype

    # Pre-cast matmul weights to the MXU dtype once in the wrapper (review item).
    wqkv = params["wqkv"].astype(mxu_dtype)
    wo = params["wo"].astype(mxu_dtype)
    w1 = params["w1"].astype(mxu_dtype)
    w2 = params["w2"].astype(mxu_dtype)

    m = seq * batch
    x2 = x.reshape(m, d)

    # 1) fused QKV projection --------------------------------------------------------
    qkv = _linear(x2, wqkv, params["bqkv"], act_dtype, mxu_dtype=mxu_dtype, tm=tm,
                  single_buffer=single_buffer_weights)                      # (M, 3d)

    # 2) scaled dot-product attention per (batch, head) -------------------------------
    qkv = qkv.reshape(seq, batch, 3, n_heads, dk)
    qkv = qkv.transpose(2, 1, 3, 0, 4).reshape(3, batch * n_heads, seq, dk)
    q, k, v = qkv[0], qkv[1], qkv[2]
    kt = jnp.swapaxes(k, 1, 2)                     # transpose outside the kernel
    attn = _attention_core(q, kt, v, scale=1.0 / (dk ** 0.5), mxu_dtype=mxu_dtype)
    attn = attn.reshape(batch, n_heads, seq, dk).transpose(2, 0, 1, 3).reshape(m, d)

    # 3) output projection + residual + LayerNorm -------------------------------------
    x_norm = _outproj_residual_layernorm(
        attn, x2, wo, params["bo"], params["ln_gamma"], params["ln_beta"], act_dtype,
        eps=eps, mxu_dtype=mxu_dtype, tm=tm, single_buffer=single_buffer_weights)

    # 4) PositionwiseFeedForward + final LayerNorm -------------------------------------
    z = _ffn_layernorm(
        x_norm, w1, params["b1"], w2, params["b2"],
        params["ln_gamma"], params["ln_beta"], act_dtype,
        eps=eps, mxu_dtype=mxu_dtype, tm=tm, single_buffer=single_buffer_weights)

    return z.reshape(seq, batch, d)


# --------------------------------------------------------------------------- reference
def reference_forward(x, params, *, n_heads, eps=1e-5, compute_dtype=None):
    """Pure-JAX reference with the same matmul-input casts as the Pallas path."""
    seq, batch, d = x.shape
    dk = d // n_heads
    cd = jnp.dtype(compute_dtype) if compute_dtype is not None else x.dtype
    f32 = jnp.float32
    scale = 1.0 / (dk ** 0.5)

    def mm(a, b):
        return jnp.dot(a.astype(cd), b.astype(cd), preferred_element_type=f32)

    def layernorm(t):
        mu = jnp.mean(t, axis=-1, keepdims=True)
        c = t - mu
        var = jnp.mean(c * c, axis=-1, keepdims=True)
        return (c * lax.rsqrt(var + eps) * params["ln_gamma"].astype(f32)
                + params["ln_beta"].astype(f32))

    x2 = x.reshape(seq * batch, d).astype(f32)
    qkv = mm(x2, params["wqkv"]) + params["bqkv"].astype(f32)
    qkv = qkv.reshape(seq, batch, 3, n_heads, dk).transpose(2, 1, 3, 0, 4)
    q, k, v = qkv[0], qkv[1], qkv[2]                      # (B, H, S, dk)
    s = jnp.einsum("bhqd,bhkd->bhqk", q.astype(cd), k.astype(cd),
                   preferred_element_type=f32) * scale
    s = s - jnp.max(s, axis=-1, keepdims=True)
    p = jnp.exp(s)
    p = p / jnp.sum(p, axis=-1, keepdims=True)
    attn = jnp.einsum("bhqk,bhkd->bhqd", p.astype(cd), v.astype(cd),
                      preferred_element_type=f32)
    attn = attn.transpose(2, 0, 1, 3).reshape(seq * batch, d)
    y = mm(attn, params["wo"]) + params["bo"].astype(f32) + x2
    xn = layernorm(y)
    h = jnp.maximum(mm(xn, params["w1"]) + params["b1"].astype(f32), 0.0)
    z = mm(h, params["w2"]) + params["b2"].astype(f32)
    out = layernorm(z)
    return out.reshape(seq, batch, d).astype(x.dtype)


# --------------------------------------------------------------------------- params
def init_params(key, d_model, d_ff, dtype=jnp.float32):
    """Deterministic init mimicking torch Linear-style uniform(+/- 1/sqrt(fan_in))."""
    ks = jax.random.split(key, 8)

    def unif(k, shape, fan_in):
        bound = 1.0 / (fan_in ** 0.5)
        return jax.random.uniform(k, shape, dtype, -bound, bound)

    return {
        "wqkv": unif(ks[0], (d_model, 3 * d_model), d_model),
        "bqkv": unif(ks[1], (3 * d_model,), d_model),
        "wo": unif(ks[2], (d_model, d_model), d_model),
        "bo": unif(ks[3], (d_model,), d_model),
        "w1": unif(ks[4], (d_model, d_ff), d_model),
        "b1": unif(ks[5], (d_ff,), d_model),
        "w2": unif(ks[6], (d_ff, d_model), d_ff),
        "b2": unif(ks[7], (d_model,), d_ff),
        "ln_gamma": jnp.ones((d_model,), dtype),
        "ln_beta": jnp.zeros((d_model,), dtype),
    }


# --------------------------------------------------------------------------- main
if __name__ == "__main__":
    key = jax.random.PRNGKey(0)
    kx, kp = jax.random.split(key)

    # Shapes implied by the module: x is (n_pixels**2, batch, n_features).
    n_pixels, batch, n_features, n_heads, n_hidden = 4, 2, 32, 4, 64
    seq = n_pixels * n_pixels
    x = jax.random.normal(kx, (seq, batch, n_features), dtype=jnp.float32)
    params = init_params(kp, n_features, n_hidden)

    def run(compute_dtype, single_buffer):
        return attention_block_forward(
            x, params, n_heads=n_heads, compute_dtype=compute_dtype,
            single_buffer_weights=single_buffer)

    # f32 path (tight check). Fall back gracefully if this build rejects
    # single-buffered (pl.Buffered(1)) weight BlockSpecs.
    single_buffer = True
    try:
        y32 = jax.block_until_ready(run(jnp.float32, True))
    except Exception:
        single_buffer = False
        y32 = jax.block_until_ready(run(jnp.float32, False))

    ref32 = reference_forward(x, params, n_heads=n_heads, compute_dtype=jnp.float32)
    assert y32.shape == x.shape
    assert jnp.allclose(y32, ref32, atol=2e-3, rtol=2e-3), "f32 mismatch vs reference"

    # bf16-MXU path (the performance configuration), checked against a reference that
    # applies the same bf16 casts at every matmul input.
    ybf = jax.block_until_ready(run(jnp.bfloat16, single_buffer))
    refbf = reference_forward(x, params, n_heads=n_heads, compute_dtype=jnp.bfloat16)
    assert jnp.allclose(ybf, refbf, atol=2e-2, rtol=2e-2), "bf16 mismatch vs reference"

    print("KERNEL_OK")
</pallas_src>

<mosaic_0001>
module attributes {stable_mosaic.version = 11 : i64} {
  func.func @_qkv_proj_kernel(%arg0: i32, %arg1: memref<16x32xf32, #tpu.memory_space<vmem>>, %arg2: memref<32x96xf32, #tpu.memory_space<vmem>>, %arg3: memref<1x96xf32, #tpu.memory_space<vmem>>, %arg4: memref<16x96xf32, #tpu.memory_space<vmem>>) attributes {dimension_semantics = [#tpu.dimension_semantics<parallel>], iteration_bounds = array<i64: 2>, scalar_prefetch = 0 : i64, scratch_operands = 0 : i64, tpu.core_type = #tpu.core_type<tc>, window_params = [{transform_indices = @transform_0, window_bounds = array<i64: 16, 32>}, {pipeline_mode = #tpu.pipeline_mode<synchronous>, transform_indices = @transform_1, window_bounds = array<i64: 32, 96>}, {pipeline_mode = #tpu.pipeline_mode<synchronous>, transform_indices = @transform_2, window_bounds = array<i64: 1, 96>}, {transform_indices = @transform_3, window_bounds = array<i64: 16, 96>}]} {
    %c0 = arith.constant 0 : index
    %c0_0 = arith.constant 0 : index
    %0 = vector.load %arg1[%c0, %c0_0] : memref<16x32xf32, #tpu.memory_space<vmem>>, vector<16x32xf32>
    %c0_1 = arith.constant 0 : index
    %c0_2 = arith.constant 0 : index
    %1 = vector.load %arg2[%c0_1, %c0_2] : memref<32x96xf32, #tpu.memory_space<vmem>>, vector<32x96xf32>
    %cst = arith.constant dense<0.000000e+00> : vector<16x96xf32>
    %2 = tpu.matmul %0, %1, %cst {dimension_numbers = #tpu.dot_dimension_numbers<[1], [0], [0], [1], [0, 0, 1, 1], [], []>} : vector<16x32xf32>, vector<32x96xf32>, vector<16x96xf32> -> vector<16x96xf32>
    %c0_3 = arith.constant 0 : index
    %c0_4 = arith.constant 0 : index
    %3 = vector.load %arg3[%c0_3, %c0_4] : memref<1x96xf32, #tpu.memory_space<vmem>>, vector<1x96xf32>
    %4 = vector.broadcast %3 : vector<1x96xf32> to vector<16x96xf32>
    %5 = arith.addf %2, %4 : vector<16x96xf32>
    %c0_5 = arith.constant 0 : index
    %c0_6 = arith.constant 0 : index
    %6 = vector.load %arg4[%c0_5, %c0_6] : memref<16x96xf32, #tpu.memory_space<vmem>>, vector<16x96xf32>
    tpu.vector_store %arg4[%c0_5, %c0_6], %5 {strides = array<i32>} : memref<16x96xf32, #tpu.memory_space<vmem>>, vector<16x96xf32>,
    return
  }
  func.func @transform_0(%arg0: i32) -> (i32, i32) {
    %c0_i32 = arith.constant 0 : i32
    %c0_i32_0 = arith.constant 0 : i32
    return %arg0, %c0_i32 : i32, i32
  }
  func.func @transform_1(%arg0: i32) -> (i32, i32) {
    %c0_i32 = arith.constant 0 : i32
    %c0_i32_0 = arith.constant 0 : i32
    %c0_i32_1 = arith.constant 0 : i32
    return %c0_i32, %c0_i32_0 : i32, i32
  }
  func.func @transform_2(%arg0: i32) -> (i32, i32) {
    %c0_i32 = arith.constant 0 : i32
    %c0_i32_0 = arith.constant 0 : i32
    %c0_i32_1 = arith.constant 0 : i32
    return %c0_i32, %c0_i32_0 : i32, i32
  }
  func.func @transform_3(%arg0: i32) -> (i32, i32) {
    %c0_i32 = arith.constant 0 : i32
    %c0_i32_0 = arith.constant 0 : i32
    return %arg0, %c0_i32 : i32, i32
  }
}

module attributes {stable_mosaic.version = 11 : i64} {
  func.func @_qkv_proj_kernel(%arg0: i32, %arg1: memref<16x32xf32, #tpu.memory_space<vmem>>, %arg2: memref<32x96xf32, #tpu.memory_space<vmem>>, %arg3: memref<1x96xf32, #tpu.memory_space<vmem>>, %arg4: memref<16x96xf32, #tpu.memory_space<vmem>>) attributes {dimension_semantics = [#tpu.dimension_semantics<parallel>], iteration_bounds = array<i64: 2>, scalar_prefetch = 0 : i64, scratch_operands = 0 : i64, tpu.core_type = #tpu.core_type<tc>, window_params = [{transform_indices = @transform_0, window_bounds = array<i64: 16, 32>}, {pipeline_mode = #tpu.pipeline_mode<synchronous>, transform_indices = @transform_1, window_bounds = array<i64: 32, 96>}, {pipeline_mode = #tpu.pipeline_mode<synchronous>, transform_indices = @transform_2, window_bounds = array<i64: 1, 96>}, {transform_indices = @transform_3, window_bounds = array<i64: 16, 96>}]} {
    %c0 = arith.constant 0 : index
    %c0_0 = arith.constant 0 : index
    %0 = vector.load %arg1[%c0, %c0_0] : memref<16x32xf32, #tpu.memory_space<vmem>>, vector<16x32xf32>
    %c0_1 = arith.constant 0 : index
    %c0_2 = arith.constant 0 : index
    %1 = vector.load %arg2[%c0_1, %c0_2] : memref<32x96xf32, #tpu.memory_space<vmem>>, vector<32x96xf32>
    %cst = arith.constant dense<0.000000e+00> : vector<16x96xf32>
    %2 = tpu.matmul %0, %1, %cst {dimension_numbers = #tpu.dot_dimension_numbers<[1], [0], [0], [1], [0, 0, 1, 1], [], []>} : vector<16x32xf32>, vector<32x96xf32>, vector<16x96xf32> -> vector<16x96xf32>
    %c0_3 = arith.constant 0 : index
    %c0_4 = arith.constant 0 : index
    %3 = vector.load %arg3[%c0_3, %c0_4] : memref<1x96xf32, #tpu.memory_space<vmem>>, vector<1x96xf32>
    %4 = vector.broadcast %3 : vector<1x96xf32> to vector<16x96xf32>
    %5 = arith.addf %2, %4 : vector<16x96xf32>
    %c0_5 = arith.constant 0 : index
    %c0_6 = arith.constant 0 : index
    %6 = vector.load %arg4[%c0_5, %c0_6] : memref<16x96xf32, #tpu.memory_space<vmem>>, vector<16x96xf32>
    tpu.vector_store %arg4[%c0_5, %c0_6], %5 {strides = array<i32>} : memref<16x96xf32, #tpu.memory_space<vmem>>, vector<16x96xf32>,
    return
  }
  func.func @transform_0(%arg0: i32) -> (i32, i32) {
    %c0_i32 = arith.constant 0 : i32
    %c0_i32_0 = arith.constant 0 : i32
    return %arg0, %c0_i32 : i32, i32
  }
  func.func @transform_1(%arg0: i32) -> (i32, i32) {
    %c0_i32 = arith.constant 0 : i32
    %c0_i32_0 = arith.constant 0 : i32
    %c0_i32_1 = arith.constant 0 : i32
    return %c0_i32, %c0_i32_0 : i32, i32
  }
  func.func @transform_2(%arg0: i32) -> (i32, i32) {
    %c0_i32 = arith.constant 0 : i32
    %c0_i32_0 = arith.constant 0 : i32
    %c0_i32_1 = arith.constant 0 : i32
    return %c0_i32, %c0_i32_0 : i32, i32
  }
  func.func @transform_3(%arg0: i32) -> (i32, i32) {
    %c0_i32 = arith.constant 0 : i32
    %c0_i32_0 = arith.constant 0 : i32
    return %arg0, %c0_i32 : i32, i32
  }
}

</mosaic_0001>

<bundles_post_ra>
// kernel: tpu_custom_call.1
= control target key start
LH: loop header
LB: loop body
LE: loop exit
PB: predicated region body
PF: predicated region fallthrough
CT: control target
= control target key end

     0   :  { %8 = vsyncpa [#allocation3], 0  ;;  %s742_s0 = inlined_call_operand.hbm [shape: f32[32,32], index: 0, kind: input, shape index: {}]   ;;  %s743_s1 = inlined_call_operand.hbm [shape: f32[32,96], index: 1, kind: input, shape index: {}]   ;;  %s744_s2 = inlined_call_operand.vmem [shape: f32[1,96], index: 2, kind: input, shape index: {}]   ;;  %s745_s3 = inlined_call_operand.hbm [shape: f32[32,96], index: 3, kind: output, shape index: {}]  }
   0x1   :  { %10 = vsyncpa [#allocation3 + $0x1], 0 }
   0x2   :  { %11 = vsyncpa [#allocation6], 0 }
   0x3   :  { %12 = vsyncpa [#allocation4], 0 }
   0x4   :  { %14 = vsyncpa [#allocation4 + $0x1], 0  ;;  %s595_s12 = smov 0   ;;  %s597_s13 = smov 0  }
   0x5   :  { %s599_s14 = smov 0   ;;  %s601_s15 = smov 0  }
   0x6 LB: > { %s616_s16 = sadd.s32 4294967295, %s568_s15   ;;  %s352_s17 = sadd.s32 4294967294, %s568_s15   ;;  %s568_s15 = sphi %s601_s15, %s755_s15   ;;  %s564_s14 = sphi %s599_s14, %s754_s14   ;;  %s560_s13 = sphi %s597_s13, %s753_s13   ;;  %s556_s12 = sphi %s595_s12, %s752_s12  }
   0x7   : > { %p40_p0 = scmp.ne.s32.totalorder %s560_s13, %s556_s12  ;;  %p41_p1 = scmp.eq.s32.totalorder %s616_s16, 0 }
   0x8   : > { %p106_p2 = scmp.eq.s32.totalorder %s616_s16, 1  ;;  %p112_p3 = scmp.eq.s32.totalorder %s352_s17, 1 }
   0x9   : > { %p625_p4 = por %p41_p1, %p40_p0  ;;  %p353_p5 = scmp.ge.s32.totalorder %s568_s15, 1 }
   0xa   : > { %p630_p6 = por %p112_p3, %p40_p0  ;;  %p119_p7 = scmp.lt.s32.totalorder %s568_s15, 3 }
   0xb   : > { %s130_s22 = sshll.u32 %s743_s1, 4  ;;  %s570_s24 = smov [#allocation5]   ;;  %s131_s22 = int_to_ptr.hbm [resolvable:$true] %s130_s22 }
   0xc   : > { %p638_p8 = pnand %p353_p5, %p119_p7  ;;  %s132_s25 = sshll.u32 %s570_s24, 4  ;;  %s133_s25 = int_to_ptr.vmem [resolvable:$true] %s132_s25 }
   0xd   : > { %s648_s26 = sadd.s32 1, %s568_s15   ;;  %s571_s27 = smov 128  }
   0xe   : > { %p384_p9 = pneg %p638_p8  ;;  %s572_s28 = smov 8  }
   0xf   : > { %s24_s29 = ssub.s32 %s568_s15, %s648_s26  ;;  %s27_s30 = sadd.s32 1, %s564_s14 }
  0x10   : > { %p385_p10 = pnand %p384_p9, %p41_p1  ;;  %p25_p12 = scmp.eq.s32.totalorder %s24_s29, 0 }
  0x11   : > { %p34_p13 = scmp.ne.s32.totalorder %s564_s14, %s560_s13  ;;  %p35_p0 = scmp.eq.s32.totalorder %s568_s15, 0 }
  0x12   : > { %387 = dma.hbm_to_vmem [thread:$0]  (!%p385_p10), %s131_s22, 512, %s133_s25, [#allocation6], %s571_s27, %s571_s27, %s572_s28  }
  0x13   : > { %s660_s4 = scalar_select %p25_p12, %s564_s14, %s27_s30  }
  0x14   : > { %p664_p3 = por %p106_p2, %p34_p13  ;;  %p397_p5 = scmp.lt.s32.totalorder %s568_s15, 2 }
  0x15   : > { %s149_s6 = sand.u32 1, %s564_s14   ;;  %s370_s7 = sshll.u32 %s568_s15, 4 }
  0x16   : > { %p36_p7 = por %p35_p0, %p34_p13  ;;  %s356_s8 = sshll.u32 %s149_s6, 4 }
  0x17   : > { %s158_s11 = scalar_lea.hbm %s742_s0, %s370_s7  ;;  %s153_s20 = scalar_lea.vmem [#allocation2], %s356_s8 }
  0x18   : > { %s159_s17 = sshll.u32 %s158_s11, 4  ;;  %s161_s21 = sshll.u32 %s153_s20, 4  ;;  %s160_s17 = int_to_ptr.hbm [resolvable:$true] %s159_s17  ;;  %s162_s21 = int_to_ptr.vmem [resolvable:$true] %s161_s21 }
  0x19   : > { %p674_p9 = pnand %p397_p5, %p36_p7  ;;  %s150_s24 = scalar_lea.sflag [#allocation3], %s149_s6 }
  0x1a   : > { %s468_s25 = sshra.s32 %s160_s17, 4  ;;  %s475_s8 = scalar_lea.hbm %s742_s0, 32  ;;  %s469_s25 = int_to_ptr.hbm [resolvable:$true] %s468_s25 }
  0x1b   : > { %s470_s29 = scalar_lea.hbm %s469_s25, 16  ;;  %p472_p10 = pneg %p674_p9 }
  0x1c   : > { %p471_p2 = scmp.ne.s32.totalorder %s469_s25, %s470_s29  ;;  %p476_p0 = scmp.lt.s32.totalorder %s469_s25, %s742_s0 }
  0x1d   : > { %p477_p5 = scmp.lt.s32.totalorder %s475_s8, %s470_s29 }
  0x1e   : > { %p473_p12 = pnand %p472_p10, %p471_p2 }
  0x1f   : > { %p478_p7 = por %p477_p5, %p476_p0 }
  0x20   : > { %p474_p13 = pneg %p473_p12 }
  0x22   : > { %p479_p11 = pnand %p478_p7, %p474_p13 }
  0x24   : > { %482 = shalt.err (!%p479_p11)
}
  0x25   : > { %391 = dma.hbm_to_vmem [thread:$0]  (!%p674_p9), %s160_s17, 256, %s162_s21, %s150_s24, %s571_s27, %s571_s27, %s572_s28  }
  0x26   : > { %173 = sbr.rel (%p638_p8) target bundleno = 187 (0xbb), region = 32  ;;  %s694_s6 = sand.u32 (!%p638_p8), 1, %s560_s13  }
  0x27   : > { %s360_s11 = sshll.u32 (!%p638_p8), %s694_s6, 4  ;;  %s176_s20 = scalar_lea.sflag (!%p638_p8), [#allocation3], %s694_s6 }
  0x28   : > { %s179_s25 = scalar_lea.vmem (!%p638_p8), [#allocation2], %s360_s11 }
  0x2b   : > { %543 = dma.done.wait (%p625_p4), %s176_s20, 256  }
  0x2c   : > { %545 = vsyncadd (%p625_p4), %s176_s20, 4294967040 }
  0x2d   : > { %547 = dma.done.wait (%p41_p1), [#allocation6], 512  }
  0x2e   : > { %549 = vsyncadd (%p41_p1), [#allocation6], 4294966784  ;;  %v215_v0 = vld [vmem:[#allocation5 + $0x18] sm:$0xff]  ;;  %v214_v1 = vld [vmem:[#allocation5 + $0x10] sm:$0xff]  ;;  %vm220_vm0 = vcmask 261120   ;;  %s371_s18 = sshll.u32 %s616_s16, 4 }
  0x2f   : > { %239 = vmatpush.msra.mxu0 %v215_v0  ;;  %372 = vmatpush.msra.mxu1 %v215_v0  ;;  %v213_v2 = vld [vmem:[#allocation5 + $0x8] sm:$0xff]  ;;  %v212_v3 = vld [vmem:[#allocation5] sm:$0xff]  ;;  %s265_s28 = scalar_lea.hbm %s745_s3, %s371_s18  ;;  %s207_s22 = scalar_lea.vmem [#allocation7], %s360_s11  ;;  %vm250_vm1 = vcmask 785408  }
  0x30   : > { %v210_v4 = vld [vmem:[%s179_s25] sm:$0xff]  ;;  %v211_v5 = vld [vmem:[%s179_s25 + $0x8] sm:$0xff]  ;;  %s266_s24 = sshll.u32 %s207_s22, 4  ;;  %s268_s29 = sshll.u32 %s265_s28, 4  ;;  %s267_s24 = int_to_ptr.vmem [resolvable:$true] %s266_s24  ;;  %s269_s29 = int_to_ptr.hbm [resolvable:$true] %s268_s29 }
  0x31   : > { %240 = vmatpush.msra.mxu0 %v214_v1  ;;  %373 = vmatpush.msra.mxu1 %v214_v1  ;;  %v437_v6 = vld [vmem:[%s744_s2] ss:$0 sm:$0xff]  ;;  %s254_s16 = scalar_lea.sflag [#allocation4], %s694_s6  ;;  %s512_s30 = sshra.s32 %s269_s29, 4  ;;  %s513_s30 = int_to_ptr.hbm [resolvable:$true] %s512_s30 }
  0x32   : > { %s514_s7 = scalar_lea.hbm %s513_s30, 16  ;;  %s518_s10 = scalar_lea.hbm %s745_s3, 32 }
  0x33   : > { %241 = vmatpush.msra.mxu0 %v213_v2  ;;  %374 = vmatpush.msra.mxu1 %v213_v2  ;;  %p515_p1 = scmp.ne.s32.totalorder %s513_s30, %s514_s7  ;;  %p519_p11 = scmp.lt.s32.totalorder %s513_s30, %s745_s3 }
  0x34   : > { %p520_p9 = scmp.lt.s32.totalorder %s518_s10, %s514_s7 }
  0x35   : > { %242 = vmatpush.msra.mxu0 %v212_v3  ;;  %375 = vmatpush.msra.mxu1 %v212_v3  ;;  %p516_p4 = pnand %p515_p1, %p664_p3 }
  0x36   : > { %363 = vmatmul.msk.f32.vlgmr.msra.gmra.mxu0 %vm220_vm0, %v210_v4  ;;  %364 = vmatmul.msk.f32.vlgmr.msra.gmra.mxu1 %vm220_vm0, %v211_v5  ;;  %p521_p2 = por %p520_p9, %p519_p11 }
  0x37   : > { %p517_p8 = pneg %p516_p4 }
  0x39   : > { %p522_p10 = pnand %p521_p2, %p517_p8 }
  0xb3   : > { %v244_v7 = vpop.f32.mrf.mxu0  ;;  %v247_v8 = vpop.f32.mrf.mxu1 }
  0xb4   : > { %v245_v9 = vadd.f32 %v437_v6, %v244_v7  ;;  %v248_v10 = vadd.f32 %v437_v6, %v247_v8 }
  0xb6   : > { %251 = vst.msk [vmem:[%s207_s22] sm:$0xff] %vm250_vm1, %v245_v9 }
  0xb7   : > { %252 = vst.msk [vmem:[%s207_s22 + $0x8] sm:$0xff] %vm250_vm1, %v248_v10 }
  0xb8   : > { %525 = shalt.err (!%p522_p10)
}
  0xb9   : > { %s573_s6 = smov 128   ;;  %s574_s25 = smov 8  }
  0xba   : > { %382 = dma.vmem_to_hbm [thread:$0]  (%p664_p3), %s267_s24, 256, %s269_s29, %s254_s16, %s573_s6, %s573_s6, %s574_s25  }
  0xbb PF: > { %s283_s18 = sand.u32 1, %s556_s12   ;;  %p751_p12 = scmp.ge.s32.totalorder %s568_s15, 2 }
  0xbc   : > { %s284_s23 = scalar_lea.sflag [#allocation4], %s283_s18 }
  0xbd   : > { %p393_p13 = pnand %p751_p12, %p630_p6 }
  0xbf   : > { %p394_p0 = pneg %p393_p13 }
  0xc1   : > { %551 = dma.done.wait (%p394_p0), %s284_s23, 256  }
  0xc2   : > { %553 = vsyncadd (%p394_p0), %s284_s23, 4294967040  ;;  %p17_p5 = scmp.ge.s32.totalorder %s648_s26, 4   ;;  %s752_s12 = smov %s560_s13 }
  0xc3   : > { %s753_s13 = smov %s564_s14  ;;  %s754_s14 = smov %s660_s4 }
  0xc4   : > { %s755_s15 = smov %s648_s26  ;;  %19 = sbr.rel (!%p17_p5) target bundleno = 6 (0x6), region = 81 }
  0xc9   :  { %290 = vsyncpa [#allocation3], 1 }
  0xca   :  { %292 = vsyncpa [#allocation3 + $0x1], 1 }
  0xcb   :  { %293 = vsyncpa [#allocation6], 1 }
  0xcc   :  { %294 = vsyncpa [#allocation4], 1 }
  0xcd   :  { %296 = vsyncpa [#allocation4 + $0x1], 1 }

// kernel: tpu_custom_call.1
= control target key start
LH: loop header
LB: loop body
LE: loop exit
PB: predicated region body
PF: predicated region fallthrough
CT: control target
= control target key end

     0   :  { %8 = vsyncpa [#allocation3], 0  ;;  %s742_s0 = inlined_call_operand.hbm [shape: f32[32,32], index: 0, kind: input, shape index: {}]   ;;  %s743_s1 = inlined_call_operand.hbm [shape: f32[32,96], index: 1, kind: input, shape index: {}]   ;;  %s744_s2 = inlined_call_operand.vmem [shape: f32[1,96], index: 2, kind: input, shape index: {}]   ;;  %s745_s3 = inlined_call_operand.hbm [shape: f32[32,96], index: 3, kind: output, shape index: {}]  }
   0x1   :  { %10 = vsyncpa [#allocation3 + $0x1], 0 }
   0x2   :  { %11 = vsyncpa [#allocation6], 0 }
   0x3   :  { %12 = vsyncpa [#allocation4], 0 }
   0x4   :  { %14 = vsyncpa [#allocation4 + $0x1], 0  ;;  %s595_s12 = smov 0   ;;  %s597_s13 = smov 0  }
   0x5   :  { %s599_s14 = smov 0   ;;  %s601_s15 = smov 0  }
   0x6 LB: > { %s616_s16 = sadd.s32 4294967295, %s568_s15   ;;  %s352_s17 = sadd.s32 4294967294, %s568_s15   ;;  %s568_s15 = sphi %s601_s15, %s755_s15   ;;  %s564_s14 = sphi %s599_s14, %s754_s14   ;;  %s560_s13 = sphi %s597_s13, %s753_s13   ;;  %s556_s12 = sphi %s595_s12, %s752_s12  }
   0x7   : > { %p40_p0 = scmp.ne.s32.totalorder %s560_s13, %s556_s12  ;;  %p41_p1 = scmp.eq.s32.totalorder %s616_s16, 0 }
   0x8   : > { %p106_p2 = scmp.eq.s32.totalorder %s616_s16, 1  ;;  %p112_p3 = scmp.eq.s32.totalorder %s352_s17, 1 }
   0x9   : > { %p625_p4 = por %p41_p1, %p40_p0  ;;  %p353_p5 = scmp.ge.s32.totalorder %s568_s15, 1 }
   0xa   : > { %p630_p6 = por %p112_p3, %p40_p0  ;;  %p119_p7 = scmp.lt.s32.totalorder %s568_s15, 3 }
   0xb   : > { %s130_s22 = sshll.u32 %s743_s1, 4  ;;  %s570_s24 = smov [#allocation5]   ;;  %s131_s22 = int_to_ptr.hbm [resolvable:$true] %s130_s22 }
   0xc   : > { %p638_p8 = pnand %p353_p5, %p119_p7  ;;  %s132_s25 = sshll.u32 %s570_s24, 4  ;;  %s133_s25 = int_to_ptr.vmem [resolvable:$true] %s132_s25 }
   0xd   : > { %s648_s26 = sadd.s32 1, %s568_s15   ;;  %s571_s27 = smov 128  }
   0xe   : > { %p384_p9 = pneg %p638_p8  ;;  %s572_s28 = smov 8  }
   0xf   : > { %s24_s29 = ssub.s32 %s568_s15, %s648_s26  ;;  %s27_s30 = sadd.s32 1, %s564_s14 }
  0x10   : > { %p385_p10 = pnand %p384_p9, %p41_p1  ;;  %p25_p12 = scmp.eq.s32.totalorder %s24_s29, 0 }
  0x11   : > { %p34_p13 = scmp.ne.s32.totalorder %s564_s14, %s560_s13  ;;  %p35_p0 = scmp.eq.s32.totalorder %s568_s15, 0 }
  0x12   : > { %387 = dma.hbm_to_vmem [thread:$0]  (!%p385_p10), %s131_s22, 512, %s133_s25, [#allocation6], %s571_s27, %s571_s27, %s572_s28  }
  0x13   : > { %s660_s4 = scalar_select %p25_p12, %s564_s14, %s27_s30  }
  0x14   : > { %p664_p3 = por %p106_p2, %p34_p13  ;;  %p397_p5 = scmp.lt.s32.totalorder %s568_s15, 2 }
  0x15   : > { %s149_s6 = sand.u32 1, %s564_s14   ;;  %s370_s7 = sshll.u32 %s568_s15, 4 }
  0x16   : > { %p36_p7 = por %p35_p0, %p34_p13  ;;  %s356_s8 = sshll.u32 %s149_s6, 4 }
  0x17   : > { %s158_s11 = scalar_lea.hbm %s742_s0, %s370_s7  ;;  %s153_s20 = scalar_lea.vmem [#allocation2], %s356_s8 }
  0x18   : > { %s159_s17 = sshll.u32 %s158_s11, 4  ;;  %s161_s21 = sshll.u32 %s153_s20, 4  ;;  %s160_s17 = int_to_ptr.hbm [resolvable:$true] %s159_s17  ;;  %s162_s21 = int_to_ptr.vmem [resolvable:$true] %s161_s21 }
  0x19   : > { %p674_p9 = pnand %p397_p5, %p36_p7  ;;  %s150_s24 = scalar_lea.sflag [#allocation3], %s149_s6 }
  0x1a   : > { %s468_s25 = sshra.s32 %s160_s17, 4  ;;  %s475_s8 = scalar_lea.hbm %s742_s0, 32  ;;  %s469_s25 = int_to_ptr.hbm [resolvable:$true] %s468_s25 }
  0x1b   : > { %s470_s29 = scalar_lea.hbm %s469_s25, 16  ;;  %p472_p10 = pneg %p674_p9 }
  0x1c   : > { %p471_p2 = scmp.ne.s32.totalorder %s469_s25, %s470_s29  ;;  %p476_p0 = scmp.lt.s32.totalorder %s469_s25, %s742_s0 }
  0x1d   : > { %p477_p5 = scmp.lt.s32.totalorder %s475_s8, %s470_s29 }
  0x1e   : > { %p473_p12 = pnand %p472_p10, %p471_p2 }
  0x1f   : > { %p478_p7 = por %p477_p5, %p476_p0 }
  0x20   : > { %p474_p13 = pneg %p473_p12 }
  0x22   : > { %p479_p11 = pnand %p478_p7, %p474_p13 }
  0x24   : > { %482 = shalt.err (!%p479_p11)
}
  0x25   : > { %391 = dma.hbm_to_vmem [thread:$0]  (!%p674_p9), %s160_s17, 256, %s162_s21, %s150_s24, %s571_s27, %s571_s27, %s572_s28  }
  0x26   : > { %173 = sbr.rel (%p638_p8) target bundleno = 187 (0xbb), region = 32  ;;  %s694_s6 = sand.u32 (!%p638_p8), 1, %s560_s13  }
  0x27   : > { %s360_s11 = sshll.u32 (!%p638_p8), %s694_s6, 4  ;;  %s176_s20 = scalar_lea.sflag (!%p638_p8), [#allocation3], %s694_s6 }
  0x28   : > { %s179_s25 = scalar_lea.vmem (!%p638_p8), [#allocation2], %s360_s11 }
  0x2b   : > { %543 = dma.done.wait (%p625_p4), %s176_s20, 256  }
  0x2c   : > { %545 = vsyncadd (%p625_p4), %s176_s20, 4294967040 }
  0x2d   : > { %547 = dma.done.wait (%p41_p1), [#allocation6], 512  }
  0x2e   : > { %549 = vsyncadd (%p41_p1), [#allocation6], 4294966784  ;;  %v215_v0 = vld [vmem:[#allocation5 + $0x18] sm:$0xff]  ;;  %v214_v1 = vld [vmem:[#allocation5 + $0x10] sm:$0xff]  ;;  %vm220_vm0 = vcmask 261120   ;;  %s371_s18 = sshll.u32 %s616_s16, 4 }
  0x2f   : > { %239 = vmatpush.msra.mxu0 %v215_v0  ;;  %372 = vmatpush.msra.mxu1 %v215_v0  ;;  %v213_v2 = vld [vmem:[#allocation5 + $0x8] sm:$0xff]  ;;  %v212_v3 = vld [vmem:[#allocation5] sm:$0xff]  ;;  %s265_s28 = scalar_lea.hbm %s745_s3, %s371_s18  ;;  %s207_s22 = scalar_lea.vmem [#allocation7], %s360_s11  ;;  %vm250_vm1 = vcmask 785408  }
  0x30   : > { %v210_v4 = vld [vmem:[%s179_s25] sm:$0xff]  ;;  %v211_v5 = vld [vmem:[%s179_s25 + $0x8] sm:$0xff]  ;;  %s266_s24 = sshll.u32 %s207_s22, 4  ;;  %s268_s29 = sshll.u32 %s265_s28, 4  ;;  %s267_s24 = int_to_ptr.vmem [resolvable:$true] %s266_s24  ;;  %s269_s29 = int_to_ptr.hbm [resolvable:$true] %s268_s29 }
  0x31   : > { %240 = vmatpush.msra.mxu0 %v214_v1  ;;  %373 = vmatpush.msra.mxu1 %v214_v1  ;;  %v437_v6 = vld [vmem:[%s744_s2] ss:$0 sm:$0xff]  ;;  %s254_s16 = scalar_lea.sflag [#allocation4], %s694_s6  ;;  %s512_s30 = sshra.s32 %s269_s29, 4  ;;  %s513_s30 = int_to_ptr.hbm [resolvable:$true] %s512_s30 }
  0x32   : > { %s514_s7 = scalar_lea.hbm %s513_s30, 16  ;;  %s518_s10 = scalar_lea.hbm %s745_s3, 32 }
  0x33   : > { %241 = vmatpush.msra.mxu0 %v213_v2  ;;  %374 = vmatpush.msra.mxu1 %v213_v2  ;;  %p515_p1 = scmp.ne.s32.totalorder %s513_s30, %s514_s7  ;;  %p519_p11 = scmp.lt.s32.totalorder %s513_s30, %s745_s3 }
  0x34   : > { %p520_p9 = scmp.lt.s32.totalorder %s518_s10, %s514_s7 }
  0x35   : > { %242 = vmatpush.msra.mxu0 %v212_v3  ;;  %375 = vmatpush.msra.mxu1 %v212_v3  ;;  %p516_p4 = pnand %p515_p1, %p664_p3 }
  0x36   : > { %363 = vmatmul.msk.f32.vlgmr.msra.gmra.mxu0 %vm220_vm0, %v210_v4  ;;  %364 = vmatmul.msk.f32.vlgmr.msra.gmra.mxu1 %vm220_vm0, %v211_v5  ;;  %p521_p2 = por %p520_p9, %p519_p11 }
  0x37   : > { %p517_p8 = pneg %p516_p4 }
  0x39   : > { %p522_p10 = pnand %p521_p2, %p517_p8 }
  0xb3   : > { %v244_v7 = vpop.f32.mrf.mxu0  ;;  %v247_v8 = vpop.f32.mrf.mxu1 }
  0xb4   : > { %v245_v9 = vadd.f32 %v437_v6, %v244_v7  ;;  %v248_v10 = vadd.f32 %v437_v6, %v247_v8 }
  0xb6   : > { %251 = vst.msk [vmem:[%s207_s22] sm:$0xff] %vm250_vm1, %v245_v9 }
  0xb7   : > { %252 = vst.msk [vmem:[%s207_s22 + $0x8] sm:$0xff] %vm250_vm1, %v248_v10 }
  0xb8   : > { %525 = shalt.err (!%p522_p10)
}
  0xb9   : > { %s573_s6 = smov 128   ;;  %s574_s25 = smov 8  }
  0xba   : > { %382 = dma.vmem_to_hbm [thread:$0]  (%p664_p3), %s267_s24, 256, %s269_s29, %s254_s16, %s573_s6, %s573_s6, %s574_s25  }
  0xbb PF: > { %s283_s18 = sand.u32 1, %s556_s12   ;;  %p751_p12 = scmp.ge.s32.totalorder %s568_s15, 2 }
  0xbc   : > { %s284_s23 = scalar_lea.sflag [#allocation4], %s283_s18 }
  0xbd   : > { %p393_p13 = pnand %p751_p12, %p630_p6 }
  0xbf   : > { %p394_p0 = pneg %p393_p13 }
  0xc1   : > { %551 = dma.done.wait (%p394_p0), %s284_s23, 256  }
  0xc2   : > { %553 = vsyncadd (%p394_p0), %s284_s23, 4294967040  ;;  %p17_p5 = scmp.ge.s32.totalorder %s648_s26, 4   ;;  %s752_s12 = smov %s560_s13 }
  0xc3   : > { %s753_s13 = smov %s564_s14  ;;  %s754_s14 = smov %s660_s4 }
  0xc4   : > { %s755_s15 = smov %s648_s26  ;;  %19 = sbr.rel (!%p17_p5) target bundleno = 6 (0x6), region = 81 }
  0xc9   :  { %290 = vsyncpa [#allocation3], 1 }
  0xca   :  { %292 = vsyncpa [#allocation3 + $0x1], 1 }
  0xcb   :  { %293 = vsyncpa [#allocation6], 1 }
  0xcc   :  { %294 = vsyncpa [#allocation4], 1 }
  0xcd   :  { %296 = vsyncpa [#allocation4 + $0x1], 1 }

</bundles_post_ra>
